<compile_context>
chip_gen: v5e
topology: v5e:2x2
jax: 0.10.0
libtpu: 0.0.40
codegen_flags: <defaults>
</compile_context>

<pallas_src>
import jax
import jax.numpy as jnp
from jax.experimental import pallas as pl
from jax.experimental.pallas import tpu as pltpu


def _round_up(v, m):
    return ((v + m - 1) // m) * m


def mlp_kernel(x_ref, w1_ref, b1_ref, w2_ref, b2_ref, o_ref):
    # x tile (tm, n_feat) f32 -> bf16 for the MXU; accumulate in f32.
    x = x_ref[...].astype(jnp.bfloat16)
    h = jnp.dot(x, w1_ref[...], preferred_element_type=jnp.float32) + b1_ref[...]
    # Second linear.  Padded hidden columns of h are exactly zero (zero-padded
    # w1/b1) and hit zero-padded rows of w2, so they contribute nothing.
    # TODO(synk): for very large n_hid on v7x, chunk the hidden dim here and
    # accumulate logits in an f32 scratch instead of materializing full h.
    logits = jnp.dot(h.astype(jnp.bfloat16), w2_ref[...],
                     preferred_element_type=jnp.float32) + b2_ref[...]
    # Numerically stable LogSoftmax over dim=1 (true nclass width, no padding).
    m = jnp.max(logits, axis=-1, keepdims=True)
    s = logits - m
    lse = jnp.log(jnp.sum(jnp.exp(s), axis=-1, keepdims=True))
    o_ref[...] = (s - lse).astype(o_ref.dtype)


def prepare_mlp_params(w1, b1, w2, b2):
    """One-time prep (hoisted out of the per-call path): pad the hidden dim to a
    multiple of 128 (lane-dense MXU passes) and cast weights to bf16.  Biases
    stay f32.  w1: (n_feat, n_hid), b1: (n_hid,) or (1, n_hid),
    w2: (n_hid, nclass), b2: (nclass,) or (1, nclass)."""
    n_feat, n_hid = w1.shape
    nclass = w2.shape[1]
    h_pad = _round_up(n_hid, 128)
    w1_p = jnp.zeros((n_feat, h_pad), jnp.bfloat16).at[:, :n_hid].set(
        w1.astype(jnp.bfloat16))
    b1_p = jnp.zeros((1, h_pad), jnp.float32).at[:, :n_hid].set(
        jnp.reshape(b1.astype(jnp.float32), (1, n_hid)))
    w2_p = jnp.zeros((h_pad, nclass), jnp.bfloat16).at[:n_hid, :].set(
        w2.astype(jnp.bfloat16))
    b2_p = jnp.reshape(b2.astype(jnp.float32), (1, nclass))
    return w1_p, b1_p, w2_p, b2_p


def _vmem_budget_bytes():
    try:
        cap = int(pltpu.get_tpu_info().vmem_capacity_bytes)
    except Exception:
        cap = 64 * 1024 * 1024  # conservative fallback: v7x per-core VMEM
    return (cap * 3) // 4       # 48 MiB on v7x, 96 MiB on v5e/v6e


def mlp_forward(x, params, *, tm=1024):
    """x: (N, n_feat), params from prepare_mlp_params -> (N, nclass) f32 log-probs."""
    w1_p, b1_p, w2_p, b2_p = params
    N, n_feat = x.shape
    h_pad = w1_p.shape[1]
    nclass = w2_p.shape[1]
    x_bytes = x.dtype.itemsize

    # Batch tile: multiple of 16 rows; at least two grid steps for large N so
    # ("parallel",) can shard the batch across v7x's two TensorCores.
    tm = max(16, min(tm, _round_up(N, 16)))
    if N >= 256:
        tm = min(tm, _round_up((N + 1) // 2, 16))

    # VMEM budget check / auto-shrink: x & out double-buffered, weights resident
    # single-buffered, plus live f32/bf16 hidden + f32 logits intermediates.
    def vmem_need(t):
        return (2 * t * n_feat * x_bytes
                + 2 * t * nclass * 4
                + n_feat * h_pad * 2 + h_pad * nclass * 2 + (h_pad + nclass) * 4
                + t * h_pad * (4 + 2) + t * nclass * 4)

    budget = _vmem_budget_bytes()
    while tm > 16 and vmem_need(tm) > budget:
        tm = max(16, _round_up(tm // 2, 16))

    grid = (pl.cdiv(N, tm),)
    cost = pl.CostEstimate(
        flops=2 * N * (n_feat * h_pad + h_pad * nclass),
        transcendentals=N * nclass,
        bytes_accessed=(N * n_feat * x_bytes + n_feat * h_pad * 2
                        + h_pad * nclass * 2 + (h_pad + nclass) * 4
                        + N * nclass * 4),
    )

    def build(single_buffer_weights):
        res_kw = ({"pipeline_mode": pl.Buffered(1)} if single_buffer_weights else {})
        return pl.pallas_call(
            mlp_kernel,
            out_shape=jax.ShapeDtypeStruct((N, nclass), jnp.float32),
            grid=grid,
            in_specs=[
                pl.BlockSpec((tm, n_feat), lambda i: (i, 0)),               # x (streamed)
                pl.BlockSpec((n_feat, h_pad), lambda i: (0, 0), **res_kw),  # w1 (resident)
                pl.BlockSpec((1, h_pad), lambda i: (0, 0), **res_kw),       # b1 (resident)
                pl.BlockSpec((h_pad, nclass), lambda i: (0, 0), **res_kw),  # w2 (resident)
                pl.BlockSpec((1, nclass), lambda i: (0, 0), **res_kw),      # b2 (resident)
            ],
            out_specs=pl.BlockSpec((tm, nclass), lambda i: (i, 0)),
            compiler_params=pltpu.CompilerParams(
                dimension_semantics=("parallel",),
                vmem_limit_bytes=budget,
            ),
            cost_estimate=cost,
        )

    try:
        return build(True)(x, w1_p, b1_p, w2_p, b2_p)
    except Exception:
        # Fallback: default (double) buffering if pipeline_mode is unsupported.
        return build(False)(x, w1_p, b1_p, w2_p, b2_p)


if __name__ == "__main__":
    # Small shapes consistent with the module: x is (batch, n_feat).
    N, n_feat, n_hid, nclass = 32, 100, 64, 10

    key = jax.random.PRNGKey(0)
    kx, k1w, k1b, k2w, k2b = jax.random.split(key, 5)

    def linear_init(kw, kb, fan_in, fan_out):
        # PyTorch nn.Linear default init: U(-1/sqrt(fan_in), +1/sqrt(fan_in)).
        bound = 1.0 / (fan_in ** 0.5)
        w = jax.random.uniform(kw, (fan_in, fan_out), jnp.float32, -bound, bound)
        b = jax.random.uniform(kb, (fan_out,), jnp.float32, -bound, bound)
        return w, b

    x = jax.random.normal(kx, (N, n_feat), jnp.float32)
    w1, b1 = linear_init(k1w, k1b, n_feat, n_hid)
    w2, b2 = linear_init(k2w, k2b, n_hid, nclass)

    params = prepare_mlp_params(w1, b1, w2, b2)  # one-time pad/cast (hoisted)
    out = mlp_forward(x, params)
    jax.block_until_ready(out)

    # Reference: f32 Linear -> Linear -> log_softmax(dim=1).  Tolerance accounts
    # for bf16 MXU inputs (accumulation is f32).
    ref = jax.nn.log_softmax((x @ w1 + b1) @ w2 + b2, axis=1)
    assert out.shape == (N, nclass)
    max_err = float(jnp.max(jnp.abs(out - ref)))
    assert jnp.allclose(out, ref, atol=5e-2, rtol=5e-2), max_err

    print("KERNEL_OK")
</pallas_src>

<mosaic_0001>
module attributes {stable_mosaic.version = 11 : i64} {
  func.func @mlp_kernel(%arg0: i32, %arg1: memref<32x100xf32, #tpu.memory_space<vmem>>, %arg2: memref<100x128xbf16, #tpu.memory_space<vmem>>, %arg3: memref<1x128xf32, #tpu.memory_space<vmem>>, %arg4: memref<128x10xbf16, #tpu.memory_space<vmem>>, %arg5: memref<1x10xf32, #tpu.memory_space<vmem>>, %arg6: memref<32x10xf32, #tpu.memory_space<vmem>>) attributes {dimension_semantics = [#tpu.dimension_semantics<parallel>], iteration_bounds = array<i64: 1>, scalar_prefetch = 0 : i64, scratch_operands = 0 : i64, tpu.core_type = #tpu.core_type<tc>, window_params = [{transform_indices = @transform_0, window_bounds = array<i64: 32, 100>}, {pipeline_mode = #tpu.pipeline_mode<synchronous>, transform_indices = @transform_1, window_bounds = array<i64: 100, 128>}, {pipeline_mode = #tpu.pipeline_mode<synchronous>, transform_indices = @transform_2, window_bounds = array<i64: 1, 128>}, {pipeline_mode = #tpu.pipeline_mode<synchronous>, transform_indices = @transform_3, window_bounds = array<i64: 128, 10>}, {pipeline_mode = #tpu.pipeline_mode<synchronous>, transform_indices = @transform_4, window_bounds = array<i64: 1, 10>}, {transform_indices = @transform_5, window_bounds = array<i64: 32, 10>}]} {
    %c0 = arith.constant 0 : index
    %c0_0 = arith.constant 0 : index
    %0 = vector.load %arg1[%c0, %c0_0] : memref<32x100xf32, #tpu.memory_space<vmem>>, vector<32x100xf32>
    %1 = arith.truncf %0 : vector<32x100xf32> to vector<32x100xbf16>
    %c0_1 = arith.constant 0 : index
    %c0_2 = arith.constant 0 : index
    %2 = vector.load %arg2[%c0_1, %c0_2] : memref<100x128xbf16, #tpu.memory_space<vmem>>, vector<100x128xbf16>
    %cst = arith.constant dense<0.000000e+00> : vector<32x128xf32>
    %3 = tpu.matmul %1, %2, %cst {dimension_numbers = #tpu.dot_dimension_numbers<[1], [0], [0], [1], [0, 0, 1, 1], [], []>} : vector<32x100xbf16>, vector<100x128xbf16>, vector<32x128xf32> -> vector<32x128xf32>
    %c0_3 = arith.constant 0 : index
    %c0_4 = arith.constant 0 : index
    %4 = vector.load %arg3[%c0_3, %c0_4] : memref<1x128xf32, #tpu.memory_space<vmem>>, vector<1x128xf32>
    %5 = vector.broadcast %4 : vector<1x128xf32> to vector<32x128xf32>
    %6 = arith.addf %3, %5 : vector<32x128xf32>
    %7 = arith.truncf %6 : vector<32x128xf32> to vector<32x128xbf16>
    %c0_5 = arith.constant 0 : index
    %c0_6 = arith.constant 0 : index
    %8 = vector.load %arg4[%c0_5, %c0_6] : memref<128x10xbf16, #tpu.memory_space<vmem>>, vector<128x10xbf16>
    %cst_7 = arith.constant dense<0.000000e+00> : vector<32x10xf32>
    %9 = tpu.matmul %7, %8, %cst_7 {dimension_numbers = #tpu.dot_dimension_numbers<[1], [0], [0], [1], [0, 0, 1, 1], [], []>} : vector<32x128xbf16>, vector<128x10xbf16>, vector<32x10xf32> -> vector<32x10xf32>
    %c0_8 = arith.constant 0 : index
    %c0_9 = arith.constant 0 : index
    %10 = vector.load %arg5[%c0_8, %c0_9] : memref<1x10xf32, #tpu.memory_space<vmem>>, vector<1x10xf32>
    %11 = vector.broadcast %10 : vector<1x10xf32> to vector<32x10xf32>
    %12 = arith.addf %9, %11 : vector<32x10xf32>
    %cst_10 = arith.constant dense<0xFF800000> : vector<32xf32>
    %13 = vector.multi_reduction <maximumf>, %12, %cst_10 [1] : vector<32x10xf32> to vector<32xf32>
    %14 = vector.shape_cast %13 : vector<32xf32> to vector<32x1xf32>
    %15 = vector.broadcast %14 : vector<32x1xf32> to vector<32x10xf32>
    %16 = arith.subf %12, %15 : vector<32x10xf32>
    %17 = math.exp %16 : vector<32x10xf32>
    %cst_11 = arith.constant dense<0.000000e+00> : vector<32xf32>
    %18 = vector.multi_reduction <add>, %17, %cst_11 [1] : vector<32x10xf32> to vector<32xf32>
    %19 = vector.shape_cast %18 : vector<32xf32> to vector<32x1xf32>
    %20 = math.log %19 : vector<32x1xf32>
    %21 = vector.broadcast %20 : vector<32x1xf32> to vector<32x10xf32>
    %22 = arith.subf %16, %21 : vector<32x10xf32>
    %c0_12 = arith.constant 0 : index
    %c0_13 = arith.constant 0 : index
    %23 = vector.load %arg6[%c0_12, %c0_13] : memref<32x10xf32, #tpu.memory_space<vmem>>, vector<32x10xf32>
    tpu.vector_store %arg6[%c0_12, %c0_13], %22 {strides = array<i32>} : memref<32x10xf32, #tpu.memory_space<vmem>>, vector<32x10xf32>,
    return
  }
  func.func @transform_0(%arg0: i32) -> (i32, i32) {
    %c0_i32 = arith.constant 0 : i32
    %c0_i32_0 = arith.constant 0 : i32
    return %arg0, %c0_i32 : i32, i32
  }
  func.func @transform_1(%arg0: i32) -> (i32, i32) {
    %c0_i32 = arith.constant 0 : i32
    %c0_i32_0 = arith.constant 0 : i32
    %c0_i32_1 = arith.constant 0 : i32
    return %c0_i32, %c0_i32_0 : i32, i32
  }
  func.func @transform_2(%arg0: i32) -> (i32, i32) {
    %c0_i32 = arith.constant 0 : i32
    %c0_i32_0 = arith.constant 0 : i32
    %c0_i32_1 = arith.constant 0 : i32
    return %c0_i32, %c0_i32_0 : i32, i32
  }
  func.func @transform_3(%arg0: i32) -> (i32, i32) {
    %c0_i32 = arith.constant 0 : i32
    %c0_i32_0 = arith.constant 0 : i32
    %c0_i32_1 = arith.constant 0 : i32
    return %c0_i32, %c0_i32_0 : i32, i32
  }
  func.func @transform_4(%arg0: i32) -> (i32, i32) {
    %c0_i32 = arith.constant 0 : i32
    %c0_i32_0 = arith.constant 0 : i32
    %c0_i32_1 = arith.constant 0 : i32
    return %c0_i32, %c0_i32_0 : i32, i32
  }
  func.func @transform_5(%arg0: i32) -> (i32, i32) {
    %c0_i32 = arith.constant 0 : i32
    %c0_i32_0 = arith.constant 0 : i32
    return %arg0, %c0_i32 : i32, i32
  }
}

module attributes {stable_mosaic.version = 11 : i64} {
  func.func @mlp_kernel(%arg0: i32, %arg1: memref<32x100xf32, #tpu.memory_space<vmem>>, %arg2: memref<100x128xbf16, #tpu.memory_space<vmem>>, %arg3: memref<1x128xf32, #tpu.memory_space<vmem>>, %arg4: memref<128x10xbf16, #tpu.memory_space<vmem>>, %arg5: memref<1x10xf32, #tpu.memory_space<vmem>>, %arg6: memref<32x10xf32, #tpu.memory_space<vmem>>) attributes {dimension_semantics = [#tpu.dimension_semantics<parallel>], iteration_bounds = array<i64: 1>, scalar_prefetch = 0 : i64, scratch_operands = 0 : i64, tpu.core_type = #tpu.core_type<tc>, window_params = [{transform_indices = @transform_0, window_bounds = array<i64: 32, 100>}, {pipeline_mode = #tpu.pipeline_mode<synchronous>, transform_indices = @transform_1, window_bounds = array<i64: 100, 128>}, {pipeline_mode = #tpu.pipeline_mode<synchronous>, transform_indices = @transform_2, window_bounds = array<i64: 1, 128>}, {pipeline_mode = #tpu.pipeline_mode<synchronous>, transform_indices = @transform_3, window_bounds = array<i64: 128, 10>}, {pipeline_mode = #tpu.pipeline_mode<synchronous>, transform_indices = @transform_4, window_bounds = array<i64: 1, 10>}, {transform_indices = @transform_5, window_bounds = array<i64: 32, 10>}]} {
    %c0 = arith.constant 0 : index
    %c0_0 = arith.constant 0 : index
    %0 = vector.load %arg1[%c0, %c0_0] : memref<32x100xf32, #tpu.memory_space<vmem>>, vector<32x100xf32>
    %1 = arith.truncf %0 : vector<32x100xf32> to vector<32x100xbf16>
    %c0_1 = arith.constant 0 : index
    %c0_2 = arith.constant 0 : index
    %2 = vector.load %arg2[%c0_1, %c0_2] : memref<100x128xbf16, #tpu.memory_space<vmem>>, vector<100x128xbf16>
    %cst = arith.constant dense<0.000000e+00> : vector<32x128xf32>
    %3 = tpu.matmul %1, %2, %cst {dimension_numbers = #tpu.dot_dimension_numbers<[1], [0], [0], [1], [0, 0, 1, 1], [], []>} : vector<32x100xbf16>, vector<100x128xbf16>, vector<32x128xf32> -> vector<32x128xf32>
    %c0_3 = arith.constant 0 : index
    %c0_4 = arith.constant 0 : index
    %4 = vector.load %arg3[%c0_3, %c0_4] : memref<1x128xf32, #tpu.memory_space<vmem>>, vector<1x128xf32>
    %5 = vector.broadcast %4 : vector<1x128xf32> to vector<32x128xf32>
    %6 = arith.addf %3, %5 : vector<32x128xf32>
    %7 = arith.truncf %6 : vector<32x128xf32> to vector<32x128xbf16>
    %c0_5 = arith.constant 0 : index
    %c0_6 = arith.constant 0 : index
    %8 = vector.load %arg4[%c0_5, %c0_6] : memref<128x10xbf16, #tpu.memory_space<vmem>>, vector<128x10xbf16>
    %cst_7 = arith.constant dense<0.000000e+00> : vector<32x10xf32>
    %9 = tpu.matmul %7, %8, %cst_7 {dimension_numbers = #tpu.dot_dimension_numbers<[1], [0], [0], [1], [0, 0, 1, 1], [], []>} : vector<32x128xbf16>, vector<128x10xbf16>, vector<32x10xf32> -> vector<32x10xf32>
    %c0_8 = arith.constant 0 : index
    %c0_9 = arith.constant 0 : index
    %10 = vector.load %arg5[%c0_8, %c0_9] : memref<1x10xf32, #tpu.memory_space<vmem>>, vector<1x10xf32>
    %11 = vector.broadcast %10 : vector<1x10xf32> to vector<32x10xf32>
    %12 = arith.addf %9, %11 : vector<32x10xf32>
    %cst_10 = arith.constant dense<0xFF800000> : vector<32xf32>
    %13 = vector.multi_reduction <maximumf>, %12, %cst_10 [1] : vector<32x10xf32> to vector<32xf32>
    %14 = vector.shape_cast %13 : vector<32xf32> to vector<32x1xf32>
    %15 = vector.broadcast %14 : vector<32x1xf32> to vector<32x10xf32>
    %16 = arith.subf %12, %15 : vector<32x10xf32>
    %17 = math.exp %16 : vector<32x10xf32>
    %cst_11 = arith.constant dense<0.000000e+00> : vector<32xf32>
    %18 = vector.multi_reduction <add>, %17, %cst_11 [1] : vector<32x10xf32> to vector<32xf32>
    %19 = vector.shape_cast %18 : vector<32xf32> to vector<32x1xf32>
    %20 = math.log %19 : vector<32x1xf32>
    %21 = vector.broadcast %20 : vector<32x1xf32> to vector<32x10xf32>
    %22 = arith.subf %16, %21 : vector<32x10xf32>
    %c0_12 = arith.constant 0 : index
    %c0_13 = arith.constant 0 : index
    %23 = vector.load %arg6[%c0_12, %c0_13] : memref<32x10xf32, #tpu.memory_space<vmem>>, vector<32x10xf32>
    tpu.vector_store %arg6[%c0_12, %c0_13], %22 {strides = array<i32>} : memref<32x10xf32, #tpu.memory_space<vmem>>, vector<32x10xf32>,
    return
  }
  func.func @transform_0(%arg0: i32) -> (i32, i32) {
    %c0_i32 = arith.constant 0 : i32
    %c0_i32_0 = arith.constant 0 : i32
    return %arg0, %c0_i32 : i32, i32
  }
  func.func @transform_1(%arg0: i32) -> (i32, i32) {
    %c0_i32 = arith.constant 0 : i32
    %c0_i32_0 = arith.constant 0 : i32
    %c0_i32_1 = arith.constant 0 : i32
    return %c0_i32, %c0_i32_0 : i32, i32
  }
  func.func @transform_2(%arg0: i32) -> (i32, i32) {
    %c0_i32 = arith.constant 0 : i32
    %c0_i32_0 = arith.constant 0 : i32
    %c0_i32_1 = arith.constant 0 : i32
    return %c0_i32, %c0_i32_0 : i32, i32
  }
  func.func @transform_3(%arg0: i32) -> (i32, i32) {
    %c0_i32 = arith.constant 0 : i32
    %c0_i32_0 = arith.constant 0 : i32
    %c0_i32_1 = arith.constant 0 : i32
    return %c0_i32, %c0_i32_0 : i32, i32
  }
  func.func @transform_4(%arg0: i32) -> (i32, i32) {
    %c0_i32 = arith.constant 0 : i32
    %c0_i32_0 = arith.constant 0 : i32
    %c0_i32_1 = arith.constant 0 : i32
    return %c0_i32, %c0_i32_0 : i32, i32
  }
  func.func @transform_5(%arg0: i32) -> (i32, i32) {
    %c0_i32 = arith.constant 0 : i32
    %c0_i32_0 = arith.constant 0 : i32
    return %arg0, %c0_i32 : i32, i32
  }
}

</mosaic_0001>

<bundles_post_ra>
// kernel: tpu_custom_call.1
= control target key start
LH: loop header
LB: loop body
LE: loop exit
PB: predicated region body
PF: predicated region fallthrough
CT: control target
= control target key end

     0   :  { %10 = vsyncpa [#allocation3], 0  ;;  %s410_s21 = smov [#allocation2]   ;;  %s411_s23 = smov 128   ;;  %s521_s0 = inlined_call_operand.hbm [shape: f32[32,100], index: 0, kind: input, shape index: {}]   ;;  %s522_s1 = inlined_call_operand.vmem [shape: bf16[100,128], index: 1, kind: input, shape index: {}]   ;;  %s523_s2 = inlined_call_operand.vmem [shape: f32[1,128], index: 2, kind: input, shape index: {}]   ;;  %s524_s3 = inlined_call_operand.vmem [shape: bf16[128,10], index: 3, kind: input, shape index: {}]   ;;  %s525_s4 = inlined_call_operand.vmem [shape: f32[1,10], index: 4, kind: input, shape index: {}]   ;;  %s526_s5 = inlined_call_operand.vmem [shape: f32[32,10], index: 5, kind: output, shape index: {}]  }
   0x1   :  { %s15_s20 = sshll.u32 %s521_s0, 4  ;;  %s17_s22 = sshll.u32 %s410_s21, 4  ;;  %s16_s20 = int_to_ptr.hbm [resolvable:$true] %s15_s20  ;;  %s18_s22 = int_to_ptr.vmem [resolvable:$true] %s17_s22 }
   0x2   :  { %s412_s24 = smov 8  }
   0x3   :  { %23 = dma.hbm_to_vmem [thread:$0]  %s16_s20, 512, %s18_s22, [#allocation3], %s411_s23, %s411_s23, %s412_s24  }
   0x4   :  { %408 = dma.done.wait [#allocation3], 512  }
   0x5   :  { %409 = vsyncadd [#allocation3], 4294966784  ;;  %v55_v0 = vld [vmem:[%s522_s1 + $0x30] sm:$0x3]  ;;  %vm106_vm0 = vcmask 1041408   ;;  %v347_v3 = vld [vmem:[%s524_s3 + $0x38] sm:$0xff] }
   0x6   :  { %v85_v1 = vunpack.c.l.b16 %v55_v0  ;;  %199 = vmatpush.bf16.msra.mxu1 %v347_v3  ;;  %v346_v5 = vld [vmem:[%s524_s3 + $0x30] sm:$0xff]  ;;  %355 = vmatpush.bf16.msra.mxu2 %v347_v3  ;;  %v339_v6 = vld [vmem:[%s522_s1 + $0x28] sm:$0xff]  ;;  %v338_v8 = vld [vmem:[%s522_s1 + $0x20] sm:$0xff]  ;;  %vm99_vm1 = vcmask 818176   ;;  %vm218_vm2 = vcmask 80896  }
   0x7   :  { %v345_v7 = vld [vmem:[%s524_s3 + $0x28] sm:$0xff]  ;;  %v344_v9 = vld [vmem:[%s524_s3 + $0x20] sm:$0xff]  ;;  %v337_v10 = vld [vmem:[%s522_s1 + $0x18] sm:$0xff] }
   0x8   :  { %v92_v2 = vpack.c.b16 %v85_v1, %v85_v1  ;;  %v343_v11 = vld [vmem:[%s524_s3 + $0x18] sm:$0xff]  ;;  %v336_v12 = vld [vmem:[%s522_s1 + $0x10] sm:$0xff]  ;;  %v335_v13 = vld [vmem:[%s522_s1 + $0x8] sm:$0xff] }
   0x9   :  { %v334_v14 = vld [vmem:[%s522_s1] sm:$0xff]  ;;  %v38_v16 = vld [vmem:[#allocation2 + $0x8] sm:$0xff]  ;;  %v39_v17 = vld [vmem:[#allocation2 + $0x10] sm:$0xff] }
   0xa   :  { %v108_v4 = vsel %vm106_vm0, %v92_v2, 0  ;;  %200 = vmatpush.bf16.msra.mxu1 %v346_v5  ;;  %356 = vmatpush.bf16.msra.mxu2 %v346_v5  ;;  %v37_v15 = vld [vmem:[#allocation2] sm:$0xff]  ;;  %v40_v18 = vld [vmem:[#allocation2 + $0x18] sm:$0xff]  ;;  %v342_v21 = vld [vmem:[%s524_s3 + $0x10] sm:$0xff] }
   0xb   :  { %111 = vmatpush.bf16.msra.mxu0 %v108_v4  ;;  %348 = vmatpush.bf16.msra.mxu3 %v108_v4  ;;  %v41_v19 = vpack.c.bf16 %v38_v16, %v37_v15  ;;  %v42_v20 = vpack.c.bf16 %v40_v18, %v39_v17  ;;  %v341_v22 = vld [vmem:[%s524_s3 + $0x8] sm:$0xff]  ;;  %v340_v23 = vld [vmem:[%s524_s3] sm:$0xff] }
   0xc   :  { %v366_v25 = vld [vmem:[%s523_s2] ss:$0 sm:$0xff] }
   0xd   :  { %v367_v35 = vld [vmem:[%s525_s4] ss:$0 sm:$0xff] }
   0xe   :  { %201 = vmatpush.bf16.msra.mxu1 %v345_v7  ;;  %357 = vmatpush.bf16.msra.mxu2 %v345_v7 }
   0xf   :  { %112 = vmatpush.bf16.msra.mxu0 %v339_v6  ;;  %349 = vmatpush.bf16.msra.mxu3 %v339_v6 }
  0x12   :  { %202 = vmatpush.bf16.msra.mxu1 %v344_v9  ;;  %358 = vmatpush.bf16.msra.mxu2 %v344_v9 }
  0x13   :  { %113 = vmatpush.bf16.msra.mxu0 %v338_v8  ;;  %350 = vmatpush.bf16.msra.mxu3 %v338_v8 }
  0x16   :  { %203 = vmatpush.bf16.msra.mxu1 %v343_v11  ;;  %359 = vmatpush.bf16.msra.mxu2 %v343_v11 }
  0x17   :  { %114 = vmatpush.bf16.msra.mxu0 %v337_v10  ;;  %351 = vmatpush.bf16.msra.mxu3 %v337_v10 }
  0x1a   :  { %204 = vmatpush.bf16.msra.mxu1 %v342_v21  ;;  %360 = vmatpush.bf16.msra.mxu2 %v342_v21 }
  0x1b   :  { %115 = vmatpush.bf16.msra.mxu0 %v336_v12  ;;  %352 = vmatpush.bf16.msra.mxu3 %v336_v12 }
  0x1e   :  { %205 = vmatpush.bf16.msra.mxu1 %v341_v22  ;;  %361 = vmatpush.bf16.msra.mxu2 %v341_v22 }
  0x1f   :  { %116 = vmatpush.bf16.msra.mxu0 %v335_v13  ;;  %353 = vmatpush.bf16.msra.mxu3 %v335_v13 }
  0x22   :  { %206 = vmatpush.bf16.msra.mxu1 %v340_v23  ;;  %362 = vmatpush.bf16.msra.mxu2 %v340_v23 }
  0x23   :  { %117 = vmatpush.bf16.msra.mxu0 %v334_v14  ;;  %354 = vmatpush.bf16.msra.mxu3 %v334_v14 }
  0x26   :  { %300 = vmatmul.msk.bf16.vlgmr.msra.gmra.mxu0 %vm99_vm1, %v41_v19  ;;  %301 = vmatmul.msk.bf16.vlgmr.msra.gmra.mxu3 %vm99_vm1, %v42_v20 }
  0xa3   :  { %v119_v24 = vpop.f32.mrf.mxu0 }
  0xa4   :  { %v120_v27 = vadd.f32 %v366_v25, %v119_v24 }
  0xa9   :  { %v124_v26 = vpop.f32.mrf.mxu3 }
  0xaa   :  { %v125_v32 = vadd.f32 %v366_v25, %v124_v26 }
  0xab   :  { %v121_v28 = vpop.f32.mrf.mxu0 }
  0xac   :  { %v122_v29 = vadd.f32 %v366_v25, %v121_v28 }
  0xae   :  { %v129_v30 = vpack.c.bf16 %v122_v29, %v120_v27 }
  0xb0   :  { %207 = vmatmul.bf16.vlgmr.msra.gmra.mxu1 %v129_v30 }
  0xb1   :  { %v126_v31 = vpop.f32.mrf.mxu3 }
  0xb2   :  { %v127_v33 = vadd.f32 %v366_v25, %v126_v31 }
  0xb4   :  { %v130_v34 = vpack.c.bf16 %v127_v33, %v125_v32 }
  0xb6   :  { %212 = vmatmul.bf16.vlgmr.msra.gmra.mxu2 %v130_v34 }
 0x12d   :  { %v208_v36 = vpop.f32.mrf.mxu1 }
 0x12e   :  { %v209_v37 = vadd.f32 %v367_v35, %v208_v36 }
 0x130   :  { %v219_v38 = vsel %vm218_vm2, %v209_v37, -inf }
 0x131   :  { %220 = vmax.xlane.f32.xlu0 %v219_v38 }
 0x135   :  { %v210_v39 = vpop.f32.mrf.mxu1 }
 0x136   :  { %v211_v40 = vadd.f32 %v367_v35, %v210_v39 }
 0x138   :  { %v222_v41 = vsel %vm218_vm2, %v211_v40, -inf }
 0x139   :  { %v213_v42 = vpop.f32.mrf.mxu2  ;;  %223 = vmax.xlane.f32.xlu0 %v222_v41 }
 0x13a   :  { %v214_v43 = vadd.f32 %v367_v35, %v213_v42 }
 0x13c   :  { %v225_v44 = vsel %vm218_vm2, %v214_v43, -inf }
 0x13d   :  { %226 = vmax.xlane.f32.xlu1 %v225_v44 }
 0x141   :  { %v215_v45 = vpop.f32.mrf.mxu2 }
 0x142   :  { %v216_v46 = vadd.f32 %v367_v35, %v215_v45 }
 0x144   :  { %v228_v47 = vsel %vm218_vm2, %v216_v46, -inf }
 0x145   :  { %229 = vmax.xlane.f32.xlu1 %v228_v47 }
 0x1a4   :  { %v221_v48 = vpop.xlane.xlu0 %220 }
 0x1a5   :  { %v231_v49 = vsub.f32 %v209_v37, %v221_v48 }
 0x1a7   :  { %v235_v50 = vmul.f32 1.442695, %v231_v49 }
 0x1a9   :  { %368 = vpow2.f32 %v235_v50 }
 0x1ac   :  { %v224_v51 = vpop.xlane.xlu0 %223 }
 0x1ad   :  { %v232_v52 = vsub.f32 %v211_v40, %v224_v51 }
 0x1af   :  { %v369_v53 = vpop.eup %368  ;;  %v237_v54 = vmul.f32 1.442695, %v232_v52 }
 0x1b0   :  { %v227_v55 = vpop.xlane.xlu1 %226  ;;  %v243_v56 = vsel %vm218_vm2, %v369_v53, 0.0 }
 0x1b1   :  { %370 = vpow2.f32 %v237_v54  ;;  %v233_v57 = vsub.f32 %v214_v43, %v227_v55  ;;  %244 = vadd.xlane.f32.xlu2 %v243_v56 }
 0x1b3   :  { %v239_v58 = vmul.f32 1.442695, %v233_v57 }
 0x1b5   :  { %372 = vpow2.f32 %v239_v58 }
 0x1b7   :  { %v371_v59 = vpop.eup %370 }
 0x1b8   :  { %v230_v60 = vpop.xlane.xlu1 %229  ;;  %v246_v61 = vsel %vm218_vm2, %v371_v59, 0.0 }
 0x1b9   :  { %v234_v62 = vsub.f32 %v216_v46, %v230_v60  ;;  %247 = vadd.xlane.f32.xlu2 %v246_v61 }
 0x1bb   :  { %v373_v63 = vpop.eup %372  ;;  %v241_v0 = vmul.f32 1.442695, %v234_v62 }
 0x1bc   :  { %v249_v1 = vsel %vm218_vm2, %v373_v63, 0.0 }
 0x1bd   :  { %374 = vpow2.f32 %v241_v0  ;;  %250 = vadd.xlane.f32.xlu0 %v249_v1 }
 0x1c3   :  { %v375_v2 = vpop.eup %374 }
 0x1c4   :  { %v252_v3 = vsel %vm218_vm2, %v375_v2, 0.0 }
 0x1c5   :  { %253 = vadd.xlane.f32.xlu1 %v252_v3 }
 0x224   :  { %v245_v4 = vpop.xlane.xlu2 %244 }
 0x225   :  { %376 = vlog2.f32 %v245_v4 }
 0x22b   :  { %v377_v5 = vpop.eup %376 }
 0x22c   :  { %v256_v6 = vmul.f32 0.6931472, %v377_v5  ;;  %v248_v7 = vpop.xlane.xlu2 %247 }
 0x22d   :  { %378 = vlog2.f32 %v248_v7 }
 0x22e   :  { %v263_v8 = vsub.f32 %v231_v49, %v256_v6 }
 0x230   :  { %267 = vst.msk [vmem:[%s526_s5] sm:$0xff] %vm218_vm2, %v263_v8  ;;  %v251_v9 = vpop.xlane.xlu0 %250 }
 0x231   :  { %380 = vlog2.f32 %v251_v9 }
 0x233   :  { %v379_v10 = vpop.eup %378 }
 0x234   :  { %v258_v11 = vmul.f32 0.6931472, %v379_v10 }
 0x236   :  { %v264_v12 = vsub.f32 %v232_v52, %v258_v11 }
 0x237   :  { %v381_v13 = vpop.eup %380 }
 0x238   :  { %268 = vst.msk [vmem:[%s526_s5 + $0x8] sm:$0xff] %vm218_vm2, %v264_v12  ;;  %v260_v14 = vmul.f32 0.6931472, %v381_v13  ;;  %v254_v15 = vpop.xlane.xlu1 %253 }
 0x239   :  { %382 = vlog2.f32 %v254_v15 }
 0x23a   :  { %v265_v16 = vsub.f32 %v233_v57, %v260_v14 }
 0x23c   :  { %269 = vst.msk [vmem:[%s526_s5 + $0x10] sm:$0xff] %vm218_vm2, %v265_v16 }
 0x23f   :  { %v383_v17 = vpop.eup %382 }
 0x240   :  { %v262_v18 = vmul.f32 0.6931472, %v383_v17 }
 0x242   :  { %v266_v19 = vsub.f32 %v234_v62, %v262_v18 }
 0x244   :  { %270 = vst.msk [vmem:[%s526_s5 + $0x18] sm:$0xff] %vm218_vm2, %v266_v19 }
 0x245   :  { %275 = vsyncpa [#allocation3], 1 }

// kernel: tpu_custom_call.1
= control target key start
LH: loop header
LB: loop body
LE: loop exit
PB: predicated region body
PF: predicated region fallthrough
CT: control target
= control target key end

     0   :  { %10 = vsyncpa [#allocation3], 0  ;;  %s410_s21 = smov [#allocation2]   ;;  %s411_s23 = smov 128   ;;  %s521_s0 = inlined_call_operand.hbm [shape: f32[32,100], index: 0, kind: input, shape index: {}]   ;;  %s522_s1 = inlined_call_operand.vmem [shape: bf16[100,128], index: 1, kind: input, shape index: {}]   ;;  %s523_s2 = inlined_call_operand.vmem [shape: f32[1,128], index: 2, kind: input, shape index: {}]   ;;  %s524_s3 = inlined_call_operand.vmem [shape: bf16[128,10], index: 3, kind: input, shape index: {}]   ;;  %s525_s4 = inlined_call_operand.vmem [shape: f32[1,10], index: 4, kind: input, shape index: {}]   ;;  %s526_s5 = inlined_call_operand.vmem [shape: f32[32,10], index: 5, kind: output, shape index: {}]  }
   0x1   :  { %s15_s20 = sshll.u32 %s521_s0, 4  ;;  %s17_s22 = sshll.u32 %s410_s21, 4  ;;  %s16_s20 = int_to_ptr.hbm [resolvable:$true] %s15_s20  ;;  %s18_s22 = int_to_ptr.vmem [resolvable:$true] %s17_s22 }
   0x2   :  { %s412_s24 = smov 8  }
   0x3   :  { %23 = dma.hbm_to_vmem [thread:$0]  %s16_s20, 512, %s18_s22, [#allocation3], %s411_s23, %s411_s23, %s412_s24  }
   0x4   :  { %408 = dma.done.wait [#allocation3], 512  }
   0x5   :  { %409 = vsyncadd [#allocation3], 4294966784  ;;  %v55_v0 = vld [vmem:[%s522_s1 + $0x30] sm:$0x3]  ;;  %vm106_vm0 = vcmask 1041408   ;;  %v347_v3 = vld [vmem:[%s524_s3 + $0x38] sm:$0xff] }
   0x6   :  { %v85_v1 = vunpack.c.l.b16 %v55_v0  ;;  %199 = vmatpush.bf16.msra.mxu1 %v347_v3  ;;  %v346_v5 = vld [vmem:[%s524_s3 + $0x30] sm:$0xff]  ;;  %355 = vmatpush.bf16.msra.mxu2 %v347_v3  ;;  %v339_v6 = vld [vmem:[%s522_s1 + $0x28] sm:$0xff]  ;;  %v338_v8 = vld [vmem:[%s522_s1 + $0x20] sm:$0xff]  ;;  %vm99_vm1 = vcmask 818176   ;;  %vm218_vm2 = vcmask 80896  }
   0x7   :  { %v345_v7 = vld [vmem:[%s524_s3 + $0x28] sm:$0xff]  ;;  %v344_v9 = vld [vmem:[%s524_s3 + $0x20] sm:$0xff]  ;;  %v337_v10 = vld [vmem:[%s522_s1 + $0x18] sm:$0xff] }
   0x8   :  { %v92_v2 = vpack.c.b16 %v85_v1, %v85_v1  ;;  %v343_v11 = vld [vmem:[%s524_s3 + $0x18] sm:$0xff]  ;;  %v336_v12 = vld [vmem:[%s522_s1 + $0x10] sm:$0xff]  ;;  %v335_v13 = vld [vmem:[%s522_s1 + $0x8] sm:$0xff] }
   0x9   :  { %v334_v14 = vld [vmem:[%s522_s1] sm:$0xff]  ;;  %v38_v16 = vld [vmem:[#allocation2 + $0x8] sm:$0xff]  ;;  %v39_v17 = vld [vmem:[#allocation2 + $0x10] sm:$0xff] }
   0xa   :  { %v108_v4 = vsel %vm106_vm0, %v92_v2, 0  ;;  %200 = vmatpush.bf16.msra.mxu1 %v346_v5  ;;  %356 = vmatpush.bf16.msra.mxu2 %v346_v5  ;;  %v37_v15 = vld [vmem:[#allocation2] sm:$0xff]  ;;  %v40_v18 = vld [vmem:[#allocation2 + $0x18] sm:$0xff]  ;;  %v342_v21 = vld [vmem:[%s524_s3 + $0x10] sm:$0xff] }
   0xb   :  { %111 = vmatpush.bf16.msra.mxu0 %v108_v4  ;;  %348 = vmatpush.bf16.msra.mxu3 %v108_v4  ;;  %v41_v19 = vpack.c.bf16 %v38_v16, %v37_v15  ;;  %v42_v20 = vpack.c.bf16 %v40_v18, %v39_v17  ;;  %v341_v22 = vld [vmem:[%s524_s3 + $0x8] sm:$0xff]  ;;  %v340_v23 = vld [vmem:[%s524_s3] sm:$0xff] }
   0xc   :  { %v366_v25 = vld [vmem:[%s523_s2] ss:$0 sm:$0xff] }
   0xd   :  { %v367_v35 = vld [vmem:[%s525_s4] ss:$0 sm:$0xff] }
   0xe   :  { %201 = vmatpush.bf16.msra.mxu1 %v345_v7  ;;  %357 = vmatpush.bf16.msra.mxu2 %v345_v7 }
   0xf   :  { %112 = vmatpush.bf16.msra.mxu0 %v339_v6  ;;  %349 = vmatpush.bf16.msra.mxu3 %v339_v6 }
  0x12   :  { %202 = vmatpush.bf16.msra.mxu1 %v344_v9  ;;  %358 = vmatpush.bf16.msra.mxu2 %v344_v9 }
  0x13   :  { %113 = vmatpush.bf16.msra.mxu0 %v338_v8  ;;  %350 = vmatpush.bf16.msra.mxu3 %v338_v8 }
  0x16   :  { %203 = vmatpush.bf16.msra.mxu1 %v343_v11  ;;  %359 = vmatpush.bf16.msra.mxu2 %v343_v11 }
  0x17   :  { %114 = vmatpush.bf16.msra.mxu0 %v337_v10  ;;  %351 = vmatpush.bf16.msra.mxu3 %v337_v10 }
  0x1a   :  { %204 = vmatpush.bf16.msra.mxu1 %v342_v21  ;;  %360 = vmatpush.bf16.msra.mxu2 %v342_v21 }
  0x1b   :  { %115 = vmatpush.bf16.msra.mxu0 %v336_v12  ;;  %352 = vmatpush.bf16.msra.mxu3 %v336_v12 }
  0x1e   :  { %205 = vmatpush.bf16.msra.mxu1 %v341_v22  ;;  %361 = vmatpush.bf16.msra.mxu2 %v341_v22 }
  0x1f   :  { %116 = vmatpush.bf16.msra.mxu0 %v335_v13  ;;  %353 = vmatpush.bf16.msra.mxu3 %v335_v13 }
  0x22   :  { %206 = vmatpush.bf16.msra.mxu1 %v340_v23  ;;  %362 = vmatpush.bf16.msra.mxu2 %v340_v23 }
  0x23   :  { %117 = vmatpush.bf16.msra.mxu0 %v334_v14  ;;  %354 = vmatpush.bf16.msra.mxu3 %v334_v14 }
  0x26   :  { %300 = vmatmul.msk.bf16.vlgmr.msra.gmra.mxu0 %vm99_vm1, %v41_v19  ;;  %301 = vmatmul.msk.bf16.vlgmr.msra.gmra.mxu3 %vm99_vm1, %v42_v20 }
  0xa3   :  { %v119_v24 = vpop.f32.mrf.mxu0 }
  0xa4   :  { %v120_v27 = vadd.f32 %v366_v25, %v119_v24 }
  0xa9   :  { %v124_v26 = vpop.f32.mrf.mxu3 }
  0xaa   :  { %v125_v32 = vadd.f32 %v366_v25, %v124_v26 }
  0xab   :  { %v121_v28 = vpop.f32.mrf.mxu0 }
  0xac   :  { %v122_v29 = vadd.f32 %v366_v25, %v121_v28 }
  0xae   :  { %v129_v30 = vpack.c.bf16 %v122_v29, %v120_v27 }
  0xb0   :  { %207 = vmatmul.bf16.vlgmr.msra.gmra.mxu1 %v129_v30 }
  0xb1   :  { %v126_v31 = vpop.f32.mrf.mxu3 }
  0xb2   :  { %v127_v33 = vadd.f32 %v366_v25, %v126_v31 }
  0xb4   :  { %v130_v34 = vpack.c.bf16 %v127_v33, %v125_v32 }
  0xb6   :  { %212 = vmatmul.bf16.vlgmr.msra.gmra.mxu2 %v130_v34 }
 0x12d   :  { %v208_v36 = vpop.f32.mrf.mxu1 }
 0x12e   :  { %v209_v37 = vadd.f32 %v367_v35, %v208_v36 }
 0x130   :  { %v219_v38 = vsel %vm218_vm2, %v209_v37, -inf }
 0x131   :  { %220 = vmax.xlane.f32.xlu0 %v219_v38 }
 0x135   :  { %v210_v39 = vpop.f32.mrf.mxu1 }
 0x136   :  { %v211_v40 = vadd.f32 %v367_v35, %v210_v39 }
 0x138   :  { %v222_v41 = vsel %vm218_vm2, %v211_v40, -inf }
 0x139   :  { %v213_v42 = vpop.f32.mrf.mxu2  ;;  %223 = vmax.xlane.f32.xlu0 %v222_v41 }
 0x13a   :  { %v214_v43 = vadd.f32 %v367_v35, %v213_v42 }
 0x13c   :  { %v225_v44 = vsel %vm218_vm2, %v214_v43, -inf }
 0x13d   :  { %226 = vmax.xlane.f32.xlu1 %v225_v44 }
 0x141   :  { %v215_v45 = vpop.f32.mrf.mxu2 }
 0x142   :  { %v216_v46 = vadd.f32 %v367_v35, %v215_v45 }
 0x144   :  { %v228_v47 = vsel %vm218_vm2, %v216_v46, -inf }
 0x145   :  { %229 = vmax.xlane.f32.xlu1 %v228_v47 }
 0x1a4   :  { %v221_v48 = vpop.xlane.xlu0 %220 }
 0x1a5   :  { %v231_v49 = vsub.f32 %v209_v37, %v221_v48 }
 0x1a7   :  { %v235_v50 = vmul.f32 1.442695, %v231_v49 }
 0x1a9   :  { %368 = vpow2.f32 %v235_v50 }
 0x1ac   :  { %v224_v51 = vpop.xlane.xlu0 %223 }
 0x1ad   :  { %v232_v52 = vsub.f32 %v211_v40, %v224_v51 }
 0x1af   :  { %v369_v53 = vpop.eup %368  ;;  %v237_v54 = vmul.f32 1.442695, %v232_v52 }
 0x1b0   :  { %v227_v55 = vpop.xlane.xlu1 %226  ;;  %v243_v56 = vsel %vm218_vm2, %v369_v53, 0.0 }
 0x1b1   :  { %370 = vpow2.f32 %v237_v54  ;;  %v233_v57 = vsub.f32 %v214_v43, %v227_v55  ;;  %244 = vadd.xlane.f32.xlu2 %v243_v56 }
 0x1b3   :  { %v239_v58 = vmul.f32 1.442695, %v233_v57 }
 0x1b5   :  { %372 = vpow2.f32 %v239_v58 }
 0x1b7   :  { %v371_v59 = vpop.eup %370 }
 0x1b8   :  { %v230_v60 = vpop.xlane.xlu1 %229  ;;  %v246_v61 = vsel %vm218_vm2, %v371_v59, 0.0 }
 0x1b9   :  { %v234_v62 = vsub.f32 %v216_v46, %v230_v60  ;;  %247 = vadd.xlane.f32.xlu2 %v246_v61 }
 0x1bb   :  { %v373_v63 = vpop.eup %372  ;;  %v241_v0 = vmul.f32 1.442695, %v234_v62 }
 0x1bc   :  { %v249_v1 = vsel %vm218_vm2, %v373_v63, 0.0 }
 0x1bd   :  { %374 = vpow2.f32 %v241_v0  ;;  %250 = vadd.xlane.f32.xlu0 %v249_v1 }
 0x1c3   :  { %v375_v2 = vpop.eup %374 }
 0x1c4   :  { %v252_v3 = vsel %vm218_vm2, %v375_v2, 0.0 }
 0x1c5   :  { %253 = vadd.xlane.f32.xlu1 %v252_v3 }
 0x224   :  { %v245_v4 = vpop.xlane.xlu2 %244 }
 0x225   :  { %376 = vlog2.f32 %v245_v4 }
 0x22b   :  { %v377_v5 = vpop.eup %376 }
 0x22c   :  { %v256_v6 = vmul.f32 0.6931472, %v377_v5  ;;  %v248_v7 = vpop.xlane.xlu2 %247 }
 0x22d   :  { %378 = vlog2.f32 %v248_v7 }
 0x22e   :  { %v263_v8 = vsub.f32 %v231_v49, %v256_v6 }
 0x230   :  { %267 = vst.msk [vmem:[%s526_s5] sm:$0xff] %vm218_vm2, %v263_v8  ;;  %v251_v9 = vpop.xlane.xlu0 %250 }
 0x231   :  { %380 = vlog2.f32 %v251_v9 }
 0x233   :  { %v379_v10 = vpop.eup %378 }
 0x234   :  { %v258_v11 = vmul.f32 0.6931472, %v379_v10 }
 0x236   :  { %v264_v12 = vsub.f32 %v232_v52, %v258_v11 }
 0x237   :  { %v381_v13 = vpop.eup %380 }
 0x238   :  { %268 = vst.msk [vmem:[%s526_s5 + $0x8] sm:$0xff] %vm218_vm2, %v264_v12  ;;  %v260_v14 = vmul.f32 0.6931472, %v381_v13  ;;  %v254_v15 = vpop.xlane.xlu1 %253 }
 0x239   :  { %382 = vlog2.f32 %v254_v15 }
 0x23a   :  { %v265_v16 = vsub.f32 %v233_v57, %v260_v14 }
 0x23c   :  { %269 = vst.msk [vmem:[%s526_s5 + $0x10] sm:$0xff] %vm218_vm2, %v265_v16 }
 0x23f   :  { %v383_v17 = vpop.eup %382 }
 0x240   :  { %v262_v18 = vmul.f32 0.6931472, %v383_v17 }
 0x242   :  { %v266_v19 = vsub.f32 %v234_v62, %v262_v18 }
 0x244   :  { %270 = vst.msk [vmem:[%s526_s5 + $0x18] sm:$0xff] %vm218_vm2, %v266_v19 }
 0x245   :  { %275 = vsyncpa [#allocation3], 1 }

</bundles_post_ra>
